<compile_context>
chip_gen: v5e
topology: v5e:2x2
jax: 0.10.0
libtpu: 0.0.40
codegen_flags: <defaults>
</compile_context>

<pallas_src>
import functools
import math

import jax
import jax.numpy as jnp
from jax.experimental import pallas as pl
from jax.experimental.pallas import tpu as pltpu


# ----------------------------------------------------------------------------
# Tiling / VMEM-budget helpers
# ----------------------------------------------------------------------------
_MiB = 1024 * 1024
_GEMM_VMEM_BUDGET = 24 * _MiB     # target working set per GEMM pallas_call


def _largest_divisor_tile(dim, cap, align):
    """Largest t <= cap with t % align == 0 and dim % t == 0, else dim."""
    if dim <= cap:
        return dim
    t = (min(cap, dim) // align) * align
    while t >= align:
        if dim % t == 0:
            return t
        t -= align
    return dim


def _gemm_row_bytes(K, N, has_residual=False):
    # Per output row: x (2-buf bf16) + out (2-buf bf16) + f32 epilogue temp
    # (+ residual, 2-buf bf16).
    bytes_ = 2 * K * 2 + 2 * N * 2 + N * 4
    if has_residual:
        bytes_ += 2 * N * 2
    return bytes_


def _vmem_limit(est_bytes):
    # Explicit scoped-VMEM limit with headroom; capped so it stays legal on
    # v7x (64 MiB physical per TensorCore).
    return int(min(max(est_bytes + 6 * _MiB, 20 * _MiB), 46 * _MiB))


# ----------------------------------------------------------------------------
# GEMM (+ bias + activation) kernels
# ----------------------------------------------------------------------------
def _gemm_bias_act_kernel(x_ref, w_ref, b_ref, o_ref, *, activation):
    """Weight-resident GEMM: full K/N per step, f32 accumulate via MXU."""
    y = jnp.dot(x_ref[...], w_ref[...], preferred_element_type=jnp.float32)
    y = y + b_ref[...]
    if activation == "gelu":
        # TODO(synk): HF RoBERTa 'gelu' is erf-based; tanh approximation used
        # for safe Mosaic lowering (numerically very close).
        y = jax.nn.gelu(y, approximate=True)
    elif activation == "tanh":
        y = jnp.tanh(y)
    o_ref[...] = y.astype(o_ref.dtype)


def _gemm_bias_act_ktiled_kernel(x_ref, w_ref, b_ref, o_ref, acc_ref, *,
                                 activation):
    """K-tiled fallback with f32 VMEM accumulator (weights too big for VMEM)."""
    @pl.when(pl.program_id(1) == 0)
    def _():
        acc_ref[...] = jnp.zeros_like(acc_ref)

    acc_ref[...] += jnp.dot(x_ref[...], w_ref[...],
                            preferred_element_type=jnp.float32)

    @pl.when(pl.program_id(1) == pl.num_programs(1) - 1)
    def _():
        y = acc_ref[...] + b_ref[...]
        if activation == "gelu":
            y = jax.nn.gelu(y, approximate=True)
        elif activation == "tanh":
            y = jnp.tanh(y)
        o_ref[...] = y.astype(o_ref.dtype)


def linear(x, w, b, activation=None, out_dtype=jnp.bfloat16):
    """x:[M,K](bf16) @ w:[K,N](bf16) + b:[N](f32), fused activation."""
    M, K = x.shape
    N = w.shape[1]
    b2 = b.reshape(1, -1)

    w_res_bytes = 2 * K * N * 2                 # resident weight, 2-buffered
    row_bytes = _gemm_row_bytes(K, N)
    if w_res_bytes + 16 * row_bytes <= _GEMM_VMEM_BUDGET:
        # Weight-resident path: weight DMA'd once, grid over M only.
        cap = min(1024, max(16, (_GEMM_VMEM_BUDGET - w_res_bytes) // row_bytes))
        tm = _largest_divisor_tile(M, cap, 16)
        est = w_res_bytes + tm * row_bytes + 4 * N * 4
        kernel = functools.partial(_gemm_bias_act_kernel, activation=activation)
        return pl.pallas_call(
            kernel,
            out_shape=jax.ShapeDtypeStruct((M, N), out_dtype),
            grid=(M // tm,),
            in_specs=[
                pl.BlockSpec((tm, K), lambda i: (i, 0)),
                pl.BlockSpec((K, N), lambda i: (0, 0)),   # constant -> fetched once
                pl.BlockSpec((1, N), lambda i: (0, 0)),
            ],
            out_specs=pl.BlockSpec((tm, N), lambda i: (i, 0)),
            compiler_params=pltpu.CompilerParams(
                dimension_semantics=("parallel",),
                vmem_limit_bytes=_vmem_limit(est)),
        )(x, w, b2)

    # Fallback: K-tiled accumulation for oversized weights.
    tm = _largest_divisor_tile(M, 256, 16)
    tk = _largest_divisor_tile(K, 512, 128)
    kernel = functools.partial(_gemm_bias_act_ktiled_kernel,
                               activation=activation)
    return pl.pallas_call(
        kernel,
        out_shape=jax.ShapeDtypeStruct((M, N), out_dtype),
        grid=(M // tm, K // tk),
        in_specs=[
            pl.BlockSpec((tm, tk), lambda i, k: (i, k)),
            pl.BlockSpec((tk, N), lambda i, k: (k, 0)),
            pl.BlockSpec((1, N), lambda i, k: (0, 0)),
        ],
        out_specs=pl.BlockSpec((tm, N), lambda i, k: (i, 0)),
        scratch_shapes=[pltpu.VMEM((tm, N), jnp.float32)],
        compiler_params=pltpu.CompilerParams(
            dimension_semantics=("parallel", "arbitrary")),
    )(x, w, b2)


# ----------------------------------------------------------------------------
# GEMM + bias + residual + LayerNorm (fused epilogue)
# ----------------------------------------------------------------------------
def _gemm_res_ln_kernel(x_ref, w_ref, b_ref, r_ref, g_ref, bt_ref, o_ref):
    y = jnp.dot(x_ref[...], w_ref[...], preferred_element_type=jnp.float32)
    y = y + b_ref[...] + r_ref[...].astype(jnp.float32)
    mu = jnp.mean(y, axis=-1, keepdims=True)
    var = jnp.mean(jnp.square(y - mu), axis=-1, keepdims=True)
    y = (y - mu) * jax.lax.rsqrt(var + 1e-12) * g_ref[...] + bt_ref[...]
    o_ref[...] = y.astype(o_ref.dtype)


def _gemm_res_ln_ktiled_kernel(x_ref, w_ref, b_ref, r_ref, g_ref, bt_ref,
                               o_ref, acc_ref):
    @pl.when(pl.program_id(1) == 0)
    def _():
        acc_ref[...] = jnp.zeros_like(acc_ref)

    acc_ref[...] += jnp.dot(x_ref[...], w_ref[...],
                            preferred_element_type=jnp.float32)

    @pl.when(pl.program_id(1) == pl.num_programs(1) - 1)
    def _():
        y = acc_ref[...] + b_ref[...] + r_ref[...].astype(jnp.float32)
        mu = jnp.mean(y, axis=-1, keepdims=True)
        var = jnp.mean(jnp.square(y - mu), axis=-1, keepdims=True)
        y = (y - mu) * jax.lax.rsqrt(var + 1e-12) * g_ref[...] + bt_ref[...]
        o_ref[...] = y.astype(o_ref.dtype)


def linear_res_ln(x, w, b, residual, gamma, beta, out_dtype=jnp.bfloat16):
    """LayerNorm(x @ w + b + residual).  N un-tiled (full-row LN stats)."""
    M, K = x.shape
    N = w.shape[1]
    b2, g2, bt2 = b.reshape(1, -1), gamma.reshape(1, -1), beta.reshape(1, -1)

    w_res_bytes = 2 * K * N * 2
    row_bytes = _gemm_row_bytes(K, N, has_residual=True)
    if w_res_bytes + 16 * row_bytes <= _GEMM_VMEM_BUDGET:
        cap = min(1024, max(16, (_GEMM_VMEM_BUDGET - w_res_bytes) // row_bytes))
        tm = _largest_divisor_tile(M, cap, 16)
        est = w_res_bytes + tm * row_bytes + 6 * N * 4
        return pl.pallas_call(
            _gemm_res_ln_kernel,
            out_shape=jax.ShapeDtypeStruct((M, N), out_dtype),
            grid=(M // tm,),
            in_specs=[
                pl.BlockSpec((tm, K), lambda i: (i, 0)),
                pl.BlockSpec((K, N), lambda i: (0, 0)),   # resident weight
                pl.BlockSpec((1, N), lambda i: (0, 0)),
                pl.BlockSpec((tm, N), lambda i: (i, 0)),
                pl.BlockSpec((1, N), lambda i: (0, 0)),
                pl.BlockSpec((1, N), lambda i: (0, 0)),
            ],
            out_specs=pl.BlockSpec((tm, N), lambda i: (i, 0)),
            compiler_params=pltpu.CompilerParams(
                dimension_semantics=("parallel",),
                vmem_limit_bytes=_vmem_limit(est)),
        )(x, w, b2, residual, g2, bt2)

    tm = _largest_divisor_tile(M, 256, 16)
    tk = _largest_divisor_tile(K, 512, 128)
    return pl.pallas_call(
        _gemm_res_ln_ktiled_kernel,
        out_shape=jax.ShapeDtypeStruct((M, N), out_dtype),
        grid=(M // tm, K // tk),
        in_specs=[
            pl.BlockSpec((tm, tk), lambda i, k: (i, k)),
            pl.BlockSpec((tk, N), lambda i, k: (k, 0)),
            pl.BlockSpec((1, N), lambda i, k: (0, 0)),
            pl.BlockSpec((tm, N), lambda i, k: (i, 0)),
            pl.BlockSpec((1, N), lambda i, k: (0, 0)),
            pl.BlockSpec((1, N), lambda i, k: (0, 0)),
        ],
        out_specs=pl.BlockSpec((tm, N), lambda i, k: (i, 0)),
        scratch_shapes=[pltpu.VMEM((tm, N), jnp.float32)],
        compiler_params=pltpu.CompilerParams(
            dimension_semantics=("parallel", "arbitrary")),
    )(x, w, b2, residual, g2, bt2)


# ----------------------------------------------------------------------------
# Fused embedding combine + LayerNorm
# ----------------------------------------------------------------------------
def _emb_ln_kernel(avg_ref, wemb_ref, nmask_ref, pos_ref, type_ref,
                   g_ref, b_ref, o_ref):
    is_node = nmask_ref[...] > 0.0                       # [tm, 1]
    x = jnp.where(is_node, avg_ref[...], wemb_ref[...])
    x = x + pos_ref[...] + type_ref[...]
    mu = jnp.mean(x, axis=-1, keepdims=True)
    var = jnp.mean(jnp.square(x - mu), axis=-1, keepdims=True)
    y = (x - mu) * jax.lax.rsqrt(var + 1e-12) * g_ref[...] + b_ref[...]
    o_ref[...] = y.astype(o_ref.dtype)


def embed_layernorm(avg_emb, word_emb, nodes_mask, pos_emb, type_row,
                    gamma, beta, out_dtype=jnp.bfloat16):
    """where(node, avg, word) + pos + type  ->  LayerNorm, all in one kernel."""
    M, H = word_emb.shape
    tm = _largest_divisor_tile(M, 256, 16)
    g2, b2, t2 = gamma.reshape(1, H), beta.reshape(1, H), type_row.reshape(1, H)
    return pl.pallas_call(
        _emb_ln_kernel,
        out_shape=jax.ShapeDtypeStruct((M, H), out_dtype),
        grid=(M // tm,),
        in_specs=[
            pl.BlockSpec((tm, H), lambda i: (i, 0)),
            pl.BlockSpec((tm, H), lambda i: (i, 0)),
            pl.BlockSpec((tm, 1), lambda i: (i, 0)),
            pl.BlockSpec((tm, H), lambda i: (i, 0)),
            pl.BlockSpec((1, H), lambda i: (0, 0)),
            pl.BlockSpec((1, H), lambda i: (0, 0)),
            pl.BlockSpec((1, H), lambda i: (0, 0)),
        ],
        out_specs=pl.BlockSpec((tm, H), lambda i: (i, 0)),
        compiler_params=pltpu.CompilerParams(
            dimension_semantics=("parallel",)),
    )(avg_emb, word_emb, nodes_mask, pos_emb, t2, g2, b2)


# ----------------------------------------------------------------------------
# Batched matmul for graph-guided node-embedding averaging (bf16 operands)
# ----------------------------------------------------------------------------
def _bmm_kernel(a_ref, b_ref, o_ref):
    o_ref[0] = jnp.dot(a_ref[0], b_ref[0], preferred_element_type=jnp.float32)


def bmm(a, b):
    """a:[B,M,K] bf16 @ b:[B,K,N] bf16 -> [B,M,N] f32."""
    # TODO(synk): tile M if S/H ever grow beyond what one (S,S)+(S,H) pair
    # of blocks can hold in VMEM.
    B, M, K = a.shape
    N = b.shape[2]
    return pl.pallas_call(
        _bmm_kernel,
        out_shape=jax.ShapeDtypeStruct((B, M, N), jnp.float32),
        grid=(B,),
        in_specs=[
            pl.BlockSpec((1, M, K), lambda i: (i, 0, 0)),
            pl.BlockSpec((1, K, N), lambda i: (i, 0, 0)),
        ],
        out_specs=pl.BlockSpec((1, M, N), lambda i: (i, 0, 0)),
        compiler_params=pltpu.CompilerParams(
            dimension_semantics=("parallel",)),
    )(a, b)


# ----------------------------------------------------------------------------
# Attention: one (batch, head) pair per grid step, additive mask bias
# ----------------------------------------------------------------------------
def _attn_head_kernel(q_ref, k_ref, v_ref, bias_ref, o_ref, *, scale):
    q = q_ref[0, 0] * scale                    # fold 1/sqrt(Dh) into q (bf16)
    k = k_ref[0, 0]
    v = v_ref[0, 0]
    s = jax.lax.dot_general(q, k, (((1,), (1,)), ((), ())),
                            preferred_element_type=jnp.float32)     # [S, S]
    s = s + bias_ref[0].astype(jnp.float32)    # additive mask (0 / -1e9)
    s = s - jnp.max(s, axis=-1, keepdims=True)
    p = jnp.exp(s)
    p = p * pl.reciprocal(jnp.sum(p, axis=-1, keepdims=True), approx=True)
    ctx = jnp.dot(p.astype(v.dtype), v, preferred_element_type=jnp.float32)
    o_ref[0, 0] = ctx.astype(o_ref.dtype)


def mha_attention(q, k, v, attn_bias):
    """q,k,v:[B,nh,S,Dh] bf16; attn_bias:[B,S,S] bf16 additive. Grid (B, nh)."""
    # TODO(synk): add a flash-style KV-tiled variant (online softmax with
    # running max/denominator scratch) when S >= ~1024.
    B, nh, S, D = q.shape
    kernel = functools.partial(_attn_head_kernel, scale=1.0 / math.sqrt(D))
    return pl.pallas_call(
        kernel,
        out_shape=jax.ShapeDtypeStruct((B, nh, S, D), jnp.bfloat16),
        grid=(B, nh),
        in_specs=[
            pl.BlockSpec((1, 1, S, D), lambda b, h: (b, h, 0, 0)),
            pl.BlockSpec((1, 1, S, D), lambda b, h: (b, h, 0, 0)),
            pl.BlockSpec((1, 1, S, D), lambda b, h: (b, h, 0, 0)),
            # Constant over the head axis -> fetched once per batch element.
            pl.BlockSpec((1, S, S), lambda b, h: (b, 0, 0)),
        ],
        out_specs=pl.BlockSpec((1, 1, S, D), lambda b, h: (b, h, 0, 0)),
        compiler_params=pltpu.CompilerParams(
            dimension_semantics=("parallel", "parallel")),
    )(q, k, v, attn_bias)


# ----------------------------------------------------------------------------
# Fused pooler (tanh) + classifier head
# ----------------------------------------------------------------------------
def _pool_cls_kernel(x_ref, wp_ref, bp_ref, wc_ref, bc_ref, o_ref):
    pooled = jnp.tanh(jnp.dot(x_ref[...], wp_ref[...],
                              preferred_element_type=jnp.float32) + bp_ref[...])
    logits = jnp.dot(pooled.astype(wc_ref.dtype), wc_ref[...],
                     preferred_element_type=jnp.float32) + bc_ref[...]
    o_ref[...] = logits


def pooler_classifier(cls_tok, pool_w, pool_b, cls_w, cls_b):
    B, H = cls_tok.shape
    L = cls_w.shape[1]
    return pl.pallas_call(
        _pool_cls_kernel,
        out_shape=jax.ShapeDtypeStruct((B, L), jnp.float32),
        grid=(1,),
        in_specs=[
            pl.BlockSpec((B, H), lambda i: (0, 0)),
            pl.BlockSpec((H, H), lambda i: (0, 0)),
            pl.BlockSpec((1, H), lambda i: (0, 0)),
            pl.BlockSpec((H, L), lambda i: (0, 0)),
            pl.BlockSpec((1, L), lambda i: (0, 0)),
        ],
        out_specs=pl.BlockSpec((B, L), lambda i: (0, 0)),
    )(cls_tok, pool_w, pool_b.reshape(1, -1), cls_w, cls_b.reshape(1, -1))


# ----------------------------------------------------------------------------
# Parameters (deterministic, synthetic).  Matmul weights stored in bf16.
# ----------------------------------------------------------------------------
def init_params(key, *, vocab, hidden, layers, intermediate, max_pos,
                type_vocab, num_labels):
    keys = iter(jax.random.split(key, 16 + 8 * layers))

    def nrm(shape, dtype=jnp.float32):
        return (0.02 * jax.random.normal(next(keys), shape, jnp.float32)
                ).astype(dtype)

    bf16 = jnp.bfloat16
    params = {
        "word_emb": nrm((vocab, hidden)),
        "pos_emb": nrm((max_pos, hidden)),
        "type_emb": nrm((type_vocab, hidden)),
        "emb_ln_g": jnp.ones((hidden,), jnp.float32),
        "emb_ln_b": jnp.zeros((hidden,), jnp.float32),
        "layers": [],
        "pool_w": nrm((hidden, hidden), bf16),
        "pool_b": jnp.zeros((hidden,), jnp.float32),
        "cls_w": nrm((hidden, num_labels), bf16),
        "cls_b": jnp.zeros((num_labels,), jnp.float32),
    }
    for _ in range(layers):
        params["layers"].append({
            "wqkv": nrm((hidden, 3 * hidden), bf16),   # fused Q/K/V projection
            "bqkv": jnp.zeros((3 * hidden,), jnp.float32),
            "wo": nrm((hidden, hidden), bf16),
            "bo": jnp.zeros((hidden,), jnp.float32),
            "ln1_g": jnp.ones((hidden,), jnp.float32),
            "ln1_b": jnp.zeros((hidden,), jnp.float32),
            "wi": nrm((hidden, intermediate), bf16),
            "bi": jnp.zeros((intermediate,), jnp.float32),
            "wo2": nrm((intermediate, hidden), bf16),
            "bo2": jnp.zeros((hidden,), jnp.float32),
            "ln2_g": jnp.ones((hidden,), jnp.float32),
            "ln2_b": jnp.zeros((hidden,), jnp.float32),
        })
    return params


# ----------------------------------------------------------------------------
# Forward pass (GraphCodeBERT encoder + pooler + classifier head)
# ----------------------------------------------------------------------------
def gcbert_classifier_forward(params, input_ids, attention_mask, node_type_ids,
                              *, num_heads):
    B, S = input_ids.shape
    H = params["word_emb"].shape[1]
    Dh = H // num_heads

    position_idx = node_type_ids                      # used as position_ids
    attn_mask = attention_mask.astype(jnp.float32)    # [B, S, S]

    # --- graph-guided node embedding averaging (codesearch/model.py) --------
    nodes_mask = position_idx == 0                    # [B, S]
    token_mask = position_idx >= 2                    # [B, S]
    w_emb = params["word_emb"][input_ids]             # [B, S, H] f32 (gather glue)
    ntm = (nodes_mask[:, :, None] & token_mask[:, None, :]).astype(jnp.float32)
    ntm = ntm * attn_mask
    ntm = ntm / (jnp.sum(ntm, axis=-1, keepdims=True) + 1e-10)
    avg_emb = bmm(ntm.astype(jnp.bfloat16), w_emb.astype(jnp.bfloat16))  # f32 out

    # --- embeddings: select + sum + LayerNorm fused in one kernel -----------
    pos_emb = params["pos_emb"][position_idx]         # [B, S, H] f32 (gather glue)
    type_row = params["type_emb"][0]                  # token_type_ids are all zero
    h = embed_layernorm(
        avg_emb.reshape(B * S, H),
        w_emb.reshape(B * S, H),
        nodes_mask.reshape(B * S, 1).astype(jnp.float32),
        pos_emb.reshape(B * S, H),
        type_row, params["emb_ln_g"], params["emb_ln_b"])   # [B*S, H] bf16
    # hidden_dropout: identity at inference

    # additive attention bias, built once and reused by every layer
    attn_bias = ((attn_mask - 1.0) * 1e9).astype(jnp.bfloat16)   # [B, S, S]

    # --- transformer layers --------------------------------------------------
    for lyr in params["layers"]:
        x2 = h                                        # [B*S, H] bf16
        qkv = linear(x2, lyr["wqkv"], lyr["bqkv"])    # fused QKV  [B*S, 3H]
        qkv = qkv.reshape(B, S, 3, num_heads, Dh)
        # TODO(synk): head-major rearrangement still goes through XLA
        # transposes; a layout-aware in-kernel rearrangement would save the
        # extra [B,S,H] HBM round trips per layer.
        q = qkv[:, :, 0].transpose(0, 2, 1, 3)        # [B, nh, S, Dh]
        k = qkv[:, :, 1].transpose(0, 2, 1, 3)
        v = qkv[:, :, 2].transpose(0, 2, 1, 3)
        ctx = mha_attention(q, k, v, attn_bias)       # [B, nh, S, Dh]
        ctx = ctx.transpose(0, 2, 1, 3).reshape(B * S, H)
        # attention output projection + residual + LayerNorm, fused
        h1 = linear_res_ln(ctx, lyr["wo"], lyr["bo"], x2,
                           lyr["ln1_g"], lyr["ln1_b"])
        inter = linear(h1, lyr["wi"], lyr["bi"], activation="gelu")
        # FFN output projection + residual + LayerNorm, fused
        h = linear_res_ln(inter, lyr["wo2"], lyr["bo2"], h1,
                          lyr["ln2_g"], lyr["ln2_b"])

    # --- pooler (tanh(W @ CLS)) + classifier head, fused ---------------------
    h = h.reshape(B, S, H)
    cls = h[:, 0, :]                                  # [B, H] bf16
    # classifier dropout: identity at inference
    logits = pooler_classifier(cls, params["pool_w"], params["pool_b"],
                               params["cls_w"], params["cls_b"])
    return logits


# ----------------------------------------------------------------------------
if __name__ == "__main__":
    key = jax.random.PRNGKey(0)
    pkey, dkey = jax.random.split(key)

    # small synthetic config
    B, S = 2, 16
    VOCAB, HIDDEN, LAYERS, HEADS, INTER, NUM_LABELS = 100, 64, 2, 4, 128, 3

    params = init_params(pkey, vocab=VOCAB, hidden=HIDDEN, layers=LAYERS,
                         intermediate=INTER, max_pos=40, type_vocab=2,
                         num_labels=NUM_LABELS)

    input_ids = jax.random.randint(dkey, (B, S), 0, VOCAB, dtype=jnp.int32)

    # GraphCodeBERT convention: first positions are DFG nodes (position 0),
    # code tokens get positions >= 2, padding gets position 1.
    lengths = jnp.array([12, 14], dtype=jnp.int32)
    idx = jnp.arange(S, dtype=jnp.int32)
    valid = idx[None, :] < lengths[:, None]                       # [B, S]
    node_type_ids = jnp.where(
        idx[None, :] < 2, 0, jnp.where(valid, idx[None, :], 1)
    ).astype(jnp.int32)
    attention_mask = (valid[:, :, None] & valid[:, None, :]).astype(jnp.float32)

    logits = gcbert_classifier_forward(
        params, input_ids, attention_mask, node_type_ids, num_heads=HEADS
    )
    jax.block_until_ready(logits)
    assert logits.shape == (B, NUM_LABELS)
    print("KERNEL_OK")
</pallas_src>

<mosaic_0001>
module attributes {stable_mosaic.version = 11 : i64} {
  func.func @_bmm_kernel(%arg0: i32, %arg1: memref<1x16x16xbf16, #tpu.memory_space<vmem>>, %arg2: memref<1x16x64xbf16, #tpu.memory_space<vmem>>, %arg3: memref<1x16x64xf32, #tpu.memory_space<vmem>>) attributes {dimension_semantics = [#tpu.dimension_semantics<parallel>], iteration_bounds = array<i64: 2>, scalar_prefetch = 0 : i64, scratch_operands = 0 : i64, tpu.core_type = #tpu.core_type<tc>, window_params = [{transform_indices = @transform_0, window_bounds = array<i64: 1, 16, 16>}, {transform_indices = @transform_1, window_bounds = array<i64: 1, 16, 64>}, {transform_indices = @transform_2, window_bounds = array<i64: 1, 16, 64>}]} {
    %c0 = arith.constant 0 : index
    %c0_0 = arith.constant 0 : index
    %c0_1 = arith.constant 0 : index
    %0 = vector.load %arg1[%c0, %c0_0, %c0_1] : memref<1x16x16xbf16, #tpu.memory_space<vmem>>, vector<1x16x16xbf16>
    %1 = vector.shape_cast %0 : vector<1x16x16xbf16> to vector<16x16xbf16>
    %c0_2 = arith.constant 0 : index
    %c0_3 = arith.constant 0 : index
    %c0_4 = arith.constant 0 : index
    %2 = vector.load %arg2[%c0_2, %c0_3, %c0_4] : memref<1x16x64xbf16, #tpu.memory_space<vmem>>, vector<1x16x64xbf16>
    %3 = vector.shape_cast %2 : vector<1x16x64xbf16> to vector<16x64xbf16>
    %cst = arith.constant dense<0.000000e+00> : vector<16x64xf32>
    %4 = tpu.matmul %1, %3, %cst {dimension_numbers = #tpu.dot_dimension_numbers<[1], [0], [0], [1], [0, 0, 1, 1], [], []>} : vector<16x16xbf16>, vector<16x64xbf16>, vector<16x64xf32> -> vector<16x64xf32>
    %c0_5 = arith.constant 0 : index
    %c0_6 = arith.constant 0 : index
    %c0_7 = arith.constant 0 : index
    %5 = vector.load %arg3[%c0_5, %c0_6, %c0_7] : memref<1x16x64xf32, #tpu.memory_space<vmem>>, vector<1x16x64xf32>
    %6 = vector.shape_cast %5 : vector<1x16x64xf32> to vector<16x64xf32>
    %7 = vector.shape_cast %4 : vector<16x64xf32> to vector<1x16x64xf32>
    tpu.vector_store %arg3[%c0_5, %c0_6, %c0_7], %7 {strides = array<i32>} : memref<1x16x64xf32, #tpu.memory_space<vmem>>, vector<1x16x64xf32>,
    return
  }
  func.func @transform_0(%arg0: i32) -> (i32, i32, i32) {
    %c0_i32 = arith.constant 0 : i32
    %c0_i32_0 = arith.constant 0 : i32
    %c0_i32_1 = arith.constant 0 : i32
    return %arg0, %c0_i32, %c0_i32_0 : i32, i32, i32
  }
  func.func @transform_1(%arg0: i32) -> (i32, i32, i32) {
    %c0_i32 = arith.constant 0 : i32
    %c0_i32_0 = arith.constant 0 : i32
    %c0_i32_1 = arith.constant 0 : i32
    return %arg0, %c0_i32, %c0_i32_0 : i32, i32, i32
  }
  func.func @transform_2(%arg0: i32) -> (i32, i32, i32) {
    %c0_i32 = arith.constant 0 : i32
    %c0_i32_0 = arith.constant 0 : i32
    %c0_i32_1 = arith.constant 0 : i32
    return %arg0, %c0_i32, %c0_i32_0 : i32, i32, i32
  }
}

</mosaic_0001>

<bundles_post_ra>
// kernel: tpu_custom_call.1
= control target key start
LH: loop header
LB: loop body
LE: loop exit
PB: predicated region body
PF: predicated region fallthrough
CT: control target
= control target key end

     0   :  { %7 = vsyncpa [#allocation3], 0  ;;  %s762_s0 = inlined_call_operand.hbm [shape: bf16[2,16,16], index: 0, kind: input, shape index: {}]   ;;  %s763_s1 = inlined_call_operand.hbm [shape: bf16[2,16,64], index: 1, kind: input, shape index: {}]   ;;  %s764_s2 = inlined_call_operand.hbm [shape: f32[2,16,64], index: 2, kind: output, shape index: {}]  }
   0x1   :  { %9 = vsyncpa [#allocation3 + $0x1], 0 }
   0x2   :  { %10 = vsyncpa [#allocation6], 0 }
   0x3   :  { %12 = vsyncpa [#allocation6 + $0x1], 0 }
   0x4   :  { %13 = vsyncpa [#allocation4], 0 }
   0x5   :  { %15 = vsyncpa [#allocation4 + $0x1], 0  ;;  %s593_s9 = smov 0   ;;  %s595_s10 = smov 0  }
   0x6   :  { %s597_s11 = smov 0   ;;  %s599_s12 = smov 0  }
   0x7 LB: > { %s614_s13 = sadd.s32 4294967295, %s572_s12   ;;  %s355_s14 = sadd.s32 4294967294, %s572_s12   ;;  %s572_s12 = sphi %s599_s12, %s775_s12   ;;  %s568_s11 = sphi %s597_s11, %s774_s11   ;;  %s564_s10 = sphi %s595_s10, %s773_s10   ;;  %s560_s9 = sphi %s593_s9, %s772_s9  }
   0x8   : > { %s618_s15 = sadd.s32 1, %s572_s12   ;;  %s28_s16 = sadd.s32 1, %s568_s11 }
   0x9   : > { %s25_s17 = ssub.s32 %s572_s12, %s618_s15  ;;  %p35_p0 = scmp.ne.s32.totalorder %s568_s11, %s564_s10 }
   0xa   : > { %p26_p1 = scmp.eq.s32.totalorder %s25_s17, 0  ;;  %p36_p2 = scmp.eq.s32.totalorder %s572_s12, 0 }
   0xb   : > { %p41_p3 = scmp.ne.s32.totalorder %s564_s10, %s560_s9  ;;  %p42_p4 = scmp.eq.s32.totalorder %s614_s13, 0 }
   0xc   : > { %s630_s18 = scalar_select %p26_p1, %s568_s11, %s28_s16  }
   0xd   : > { %p632_p5 = por %p36_p2, %p35_p0  ;;  %p636_p6 = por %p42_p4, %p41_p3 }
   0xe   : > { %p91_p7 = scmp.eq.s32.totalorder %s614_s13, 1  ;;  %p97_p8 = scmp.eq.s32.totalorder %s355_s14, 1 }
   0xf   : > { %p404_p10 = scmp.lt.s32.totalorder %s572_s12, 2  ;;  %s652_s23 = sand.u32 1, %s568_s11  }
  0x10   : > { %p643_p11 = por %p91_p7, %p35_p0  ;;  %p647_p12 = por %p97_p8, %p41_p3 }
  0x11   : > { %s382_s24 = sshll.u32 %s572_s12, 3  ;;  %s358_s25 = sshll.u32 %s652_s23, 3 }
  0x12   : > { %s126_s28 = scalar_lea.hbm %s762_s0, %s382_s24  ;;  %s121_s30 = scalar_lea.vmem [#allocation2], %s358_s25 }
  0x13   : > { %s127_s29 = sshll.u32 %s126_s28, 4  ;;  %s129_s3 = sshll.u32 %s121_s30, 4  ;;  %s128_s29 = int_to_ptr.hbm [resolvable:$true] %s127_s29  ;;  %s130_s3 = int_to_ptr.vmem [resolvable:$true] %s129_s3 }
  0x14   : > { %p665_p13 = pnand %p404_p10, %p632_p5  ;;  %p364_p0 = scmp.ge.s32.totalorder %s572_s12, 1 }
  0x15   : > { %p159_p1 = scmp.lt.s32.totalorder %s572_s12, 3  ;;  %s118_s5 = scalar_lea.sflag [#allocation3], %s652_s23 }
  0x16   : > { %s442_s6 = sshra.s32 %s128_s29, 4  ;;  %p446_p3 = pneg %p665_p13  ;;  %s443_s6 = int_to_ptr.hbm [resolvable:$true] %s442_s6 }
  0x17   : > { %s444_s7 = scalar_lea.hbm %s443_s6, 8  ;;  %s449_s16 = scalar_lea.hbm %s762_s0, 16 }
  0x18   : > { %p445_p2 = scmp.ne.s32.totalorder %s443_s6, %s444_s7  ;;  %p450_p5 = scmp.lt.s32.totalorder %s443_s6, %s762_s0 }
  0x19   : > { %p451_p8 = scmp.lt.s32.totalorder %s449_s16, %s444_s7 }
  0x1a   : > { %p447_p4 = pnand %p446_p3, %p445_p2 }
  0x1b   : > { %p452_p10 = por %p451_p8, %p450_p5 }
  0x1c   : > { %p448_p7 = pneg %p447_p4 }
  0x1e   : > { %p453_p9 = pnand %p452_p10, %p448_p7 }
  0x20   : > { %456 = shalt.err (!%p453_p9)
}
  0x21   : > { %s574_s26 = smov 64   ;;  %s575_s27 = smov 4  }
  0x22   : > { %396 = dma.hbm_to_vmem [thread:$0]  (!%p665_p13), %s128_s29, 128, %s130_s3, %s118_s5, %s574_s26, %s574_s26, %s575_s27  }
  0x23   : > { %p689_p2 = pnand %p364_p0, %p159_p1  ;;  %s148_s7 = scalar_lea.hbm %s763_s1, %s382_s24 }
  0x24   : > { %s149_s8 = sshll.u32 %s148_s7, 4  ;;  %s143_s14 = scalar_lea.vmem [#allocation5], %s358_s25  ;;  %s150_s8 = int_to_ptr.hbm [resolvable:$true] %s149_s8 }
  0x25   : > { %s151_s16 = sshll.u32 %s143_s14, 4  ;;  %s140_s17 = scalar_lea.sflag [#allocation6], %s652_s23  ;;  %s152_s16 = int_to_ptr.vmem [resolvable:$true] %s151_s16 }
  0x26   : > { %s472_s19 = sshra.s32 %s150_s8, 4  ;;  %s479_s30 = scalar_lea.hbm %s763_s1, 16  ;;  %s473_s19 = int_to_ptr.hbm [resolvable:$true] %s472_s19 }
  0x27   : > { %s474_s29 = scalar_lea.hbm %s473_s19, 8  ;;  %p480_p4 = scmp.lt.s32.totalorder %s473_s19, %s763_s1 }
  0x28   : > { %p475_p9 = scmp.ne.s32.totalorder %s473_s19, %s474_s29  ;;  %p481_p7 = scmp.lt.s32.totalorder %s479_s30, %s474_s29 }
  0x2a   : > { %p477_p0 = pnand %p475_p9, %p446_p3  ;;  %p482_p5 = por %p481_p7, %p480_p4 }
  0x2c   : > { %p478_p1 = pneg %p477_p0 }
  0x2e   : > { %p483_p8 = pnand %p482_p5, %p478_p1 }
  0x30   : > { %486 = shalt.err (!%p483_p8)
}
  0x31   : > { %399 = dma.hbm_to_vmem [thread:$0]  (!%p665_p13), %s150_s8, 128, %s152_s16, %s140_s17, %s574_s26, %s574_s26, %s575_s27  }
  0x32   : > { %163 = sbr.rel (%p689_p2) target bundleno = 200 (0xc8), region = 28  ;;  %s715_s23 = sand.u32 (!%p689_p2), 1, %s564_s10  }
  0x33   : > { %s365_s25 = sshll.u32 (!%p689_p2), %s715_s23, 3  ;;  %s166_s7 = scalar_lea.sflag (!%p689_p2), [#allocation3], %s715_s23 }
  0x34   : > { %s169_s14 = scalar_lea.vmem (!%p689_p2), [#allocation2], %s365_s25 }
  0x37   : > { %547 = dma.done.wait (%p636_p6), %s166_s7, 128  }
  0x38   : > { %549 = vsyncadd (%p636_p6), %s166_s7, 4294967168  ;;  %s176_s4 = scalar_lea.sflag [#allocation6], %s715_s23  ;;  %s179_s26 = scalar_lea.vmem [#allocation5], %s365_s25 }
  0x39   : > { %551 = dma.done.wait (%p636_p6), %s176_s4, 128  }
  0x3a   : > { %553 = vsyncadd (%p636_p6), %s176_s4, 4294967168  ;;  %v385_v0 = vld [vmem:[%s179_s26] sm:$0xff]  ;;  %v384_v1 = vld [vmem:[%s169_s14] sm:$0xff]  ;;  %vm222_vm0 = vcmask 130048   ;;  %s367_s27 = sshll.u32 %s715_s23, 4  ;;  %s386_s28 = sshll.u32 %s614_s13, 4 }
  0x3b   : > { %233 = vmatpush.bf16.msra.mxu0 %v385_v0  ;;  %vm240_vm1 = vcmask 523264   ;;  %s255_s17 = scalar_lea.hbm %s764_s2, %s386_s28  ;;  %s205_s19 = scalar_lea.vmem [#allocation7], %s367_s27 }
  0x3c   : > { %s256_s20 = sshll.u32 %s205_s19, 4  ;;  %s258_s29 = sshll.u32 %s255_s17, 4  ;;  %s257_s20 = int_to_ptr.vmem [resolvable:$true] %s256_s20  ;;  %s259_s29 = int_to_ptr.hbm [resolvable:$true] %s258_s29 }
  0x3d   : > { %s244_s3 = scalar_lea.sflag [#allocation4], %s715_s23  ;;  %s516_s5 = sshra.s32 %s259_s29, 4  ;;  %s517_s5 = int_to_ptr.hbm [resolvable:$true] %s516_s5 }
  0x3e   : > { %376 = vmatmul.msk.bf16.vlgmr.msra.gmra.mxu0 %vm222_vm0, %v384_v1  ;;  %s518_s30 = scalar_lea.hbm %s517_s5, 16  ;;  %s522_s6 = scalar_lea.hbm %s764_s2, 32 }
  0x3f   : > { %p519_p6 = scmp.ne.s32.totalorder %s517_s5, %s518_s30  ;;  %p523_p10 = scmp.lt.s32.totalorder %s517_s5, %s764_s2 }
  0x40   : > { %p524_p2 = scmp.lt.s32.totalorder %s522_s6, %s518_s30 }
  0x41   : > { %p520_p13 = pnand %p519_p6, %p643_p11 }
  0x42   : > { %p525_p9 = por %p524_p2, %p523_p10 }
  0x43   : > { %p521_p3 = pneg %p520_p13 }
  0x45   : > { %p526_p0 = pnand %p525_p9, %p521_p3 }
  0xbb   : > { %v235_v2 = vpop.f32.mrf.mxu0 }
  0xbc   : > { %241 = vst.msk [vmem:[%s205_s19] sm:$0xff] %vm240_vm1, %v235_v2 }
  0xc3   : > { %v237_v3 = vpop.f32.mrf.mxu0 }
  0xc4   : > { %242 = vst.msk [vmem:[%s205_s19 + $0x8] sm:$0xff] %vm240_vm1, %v237_v3 }
  0xc5   : > { %529 = shalt.err (!%p526_p0)
}
  0xc6   : > { %s576_s23 = smov 128   ;;  %s577_s14 = smov 8  }
  0xc7   : > { %391 = dma.vmem_to_hbm [thread:$0]  (%p643_p11), %s257_s20, 256, %s259_s29, %s244_s3, %s576_s23, %s576_s23, %s577_s14  }
  0xc8 PF: > { %s273_s4 = sand.u32 1, %s560_s9   ;;  %p771_p1 = scmp.ge.s32.totalorder %s572_s12, 2 }
  0xc9   : > { %s274_s26 = scalar_lea.sflag [#allocation4], %s273_s4 }
  0xca   : > { %p401_p4 = pnand %p771_p1, %p647_p12 }
  0xcc   : > { %p402_p7 = pneg %p401_p4 }
  0xce   : > { %555 = dma.done.wait (%p402_p7), %s274_s26, 256  }
  0xcf   : > { %557 = vsyncadd (%p402_p7), %s274_s26, 4294967040  ;;  %p18_p5 = scmp.ge.s32.totalorder %s618_s15, 4   ;;  %s772_s9 = smov %s564_s10 }
  0xd0   : > { %s773_s10 = smov %s568_s11  ;;  %s774_s11 = smov %s630_s18 }
  0xd1   : > { %s775_s12 = smov %s618_s15  ;;  %20 = sbr.rel (!%p18_p5) target bundleno = 7 (0x7), region = 86 }
  0xd6   :  { %280 = vsyncpa [#allocation3], 1 }
  0xd7   :  { %282 = vsyncpa [#allocation3 + $0x1], 1 }
  0xd8   :  { %283 = vsyncpa [#allocation6], 1 }
  0xd9   :  { %285 = vsyncpa [#allocation6 + $0x1], 1 }
  0xda   :  { %286 = vsyncpa [#allocation4], 1 }
  0xdb   :  { %288 = vsyncpa [#allocation4 + $0x1], 1 }

</bundles_post_ra>
